<compile_context>
chip_gen: v6e
topology: v6e:2x2x1
jax: 0.10.0
libtpu: 0.0.40
codegen_flags: <defaults>
</compile_context>

<pallas_src>
import functools

import numpy as np
import jax
import jax.numpy as jnp
from jax import lax
from jax.experimental import pallas as pl
from jax.experimental.pallas import tpu as pltpu

N_CLASSES = 22
N_FEAT = 32
PSP_SIZES = (1, 2, 3, 6)
# (planes, nblocks, stride, dilation) -- dilated ResNet-34, output stride 8.
LAYER_CFG = ((64, 3, 1, 1), (128, 4, 2, 1), (256, 6, 1, 2), (512, 3, 1, 4))


def _round_up(x, m):
    return ((x + m - 1) // m) * m


def _cdiv(a, b):
    return -(-a // b)


# ----------------------------------------------------------------------------
# Generation-aware VMEM budget (v7x: 64 MiB/TC, v5e/v6e: 128 MiB)
# ----------------------------------------------------------------------------

def _vmem_capacity_bytes():
    try:
        info = pltpu.get_tpu_info()
        cap = getattr(info, "vmem_capacity_bytes", None)
        if cap:
            return int(cap)
    except Exception:
        pass
    return 64 * 1024 * 1024          # conservative fallback (v7x per-TC size)


_VMEM_CAP = _vmem_capacity_bytes()
_VMEM_LIMIT = max(min(int(_VMEM_CAP * 0.78), _VMEM_CAP - (16 << 20)), 32 << 20)
_TILE_BUDGET = max(int(_VMEM_LIMIT * 0.85), 24 << 20)


# ----------------------------------------------------------------------------
# Packed conv parameter container (arrays traced, metadata static)
# ----------------------------------------------------------------------------

@jax.tree_util.register_pytree_node_class
class PackedConv:
    """Conv weight pre-packed for the Pallas GEMM: exact (K, Cout) bf16 + (1, Cout) f32 bias."""

    def __init__(self, w, b, kh, kw, cout):
        self.w, self.b = w, b
        self.kh, self.kw, self.cout = kh, kw, cout

    def tree_flatten(self):
        return (self.w, self.b), (self.kh, self.kw, self.cout)

    @classmethod
    def tree_unflatten(cls, aux, children):
        w, b = children
        return cls(w, b, *aux)


def pack_conv(w_oihw, b):
    """OIHW f32 weight + bias -> exact (kh*kw*cin, cout) bf16 matrix (packed once)."""
    cout, cin, kh, kw = w_oihw.shape
    K = kh * kw * cin
    wkn = jnp.transpose(w_oihw, (2, 3, 1, 0)).reshape(K, cout).astype(jnp.bfloat16)
    bp = jnp.asarray(b, jnp.float32).reshape(1, cout)
    return PackedConv(wkn, bp, kh, kw, cout)


# ----------------------------------------------------------------------------
# Pallas matmul kernels (bf16 MXU, f32 accumulate, fused epilogue)
# ----------------------------------------------------------------------------

@functools.lru_cache(maxsize=None)
def _make_matmul_kernel(alpha, has_residual, single_k, softmax_groups):
    """alpha == 0.0 -> ReLU, alpha == 1.0 -> identity, else PReLU(alpha).
    Optional fused residual add and optional per-lane-group channel LogSoftmax."""

    def _epilogue(acc, bias, res):
        r = acc + bias
        if has_residual:
            r = r + res.astype(jnp.float32)
        if alpha == 0.0:
            r = jnp.maximum(r, 0.0)
        elif alpha != 1.0:
            r = jnp.where(r >= 0.0, r, alpha * r)
        if softmax_groups is not None:
            # Channel LogSoftmax fused here: channels live on lanes, so the
            # max / logsumexp are cheap XLU cross-lane reductions.
            lane = lax.broadcasted_iota(jnp.int32, r.shape, 1)
            out_v = r
            for lo, hi in softmax_groups:
                g = (lane >= lo) & (lane < hi)
                m = jnp.max(jnp.where(g, r, -jnp.inf), axis=1, keepdims=True)
                e = jnp.exp(jnp.where(g, r - m, -jnp.inf))
                lse = m + jnp.log(jnp.sum(e, axis=1, keepdims=True))
                out_v = jnp.where(g, r - lse, out_v)
            r = out_v
        return r

    if single_k:
        def kernel(*refs):
            if has_residual:
                a_ref, b_ref, bias_ref, res_ref, o_ref = refs
            else:
                a_ref, b_ref, bias_ref, o_ref = refs
                res_ref = None
            acc = jnp.dot(a_ref[...], b_ref[...], preferred_element_type=jnp.float32)
            r = _epilogue(acc, bias_ref[...],
                          None if res_ref is None else res_ref[...])
            o_ref[...] = r.astype(o_ref.dtype)
    else:
        def kernel(*refs):
            if has_residual:
                a_ref, b_ref, bias_ref, res_ref, o_ref, acc_ref = refs
            else:
                a_ref, b_ref, bias_ref, o_ref, acc_ref = refs
                res_ref = None
            k = pl.program_id(2)

            @pl.when(k == 0)
            def _init():
                acc_ref[...] = jnp.zeros_like(acc_ref)

            acc_ref[...] += jnp.dot(a_ref[...], b_ref[...],
                                    preferred_element_type=jnp.float32)

            @pl.when(k == pl.num_programs(2) - 1)
            def _finish():
                r = _epilogue(acc_ref[...], bias_ref[...],
                              None if res_ref is None else res_ref[...])
                o_ref[...] = r.astype(o_ref.dtype)

    return kernel


def _plan_gemm(M, K, Nn, has_res, out_bytes, force_full_n=False):
    """Pick (TM, TN, TK).  Prefer one K step with the weight tile VMEM-resident."""
    if force_full_n:
        TN = Nn
    else:
        TN = Nn
        for t in (512, 256, 128):
            if Nn % t == 0:
                TN = t
                break

    def tile_bytes(tm, tk, scratch):
        v = 2 * (tm * tk + tk * TN) * 2               # A + B, bf16, double-buffered
        v += 2 * tm * TN * out_bytes + 2 * 4 * TN     # out (double-buffered) + bias
        if has_res:
            v += 2 * tm * TN * 2
        if scratch:
            v += tm * TN * 4
        return v

    if M <= 8:
        tm_opts = [M]
    else:
        cap = _round_up(M, 8)
        tm_opts = [t for t in (1024, 512, 256, 128, 64, 32, 16, 8) if t <= cap]
        if not tm_opts:
            tm_opts = [8]

    TM = None
    TK = K
    for tm in tm_opts:                                 # single K step preferred
        if tile_bytes(tm, K, False) <= _TILE_BUDGET:
            TM = tm
            TK = K
            break
    if TM is None:                                     # split-K fallback
        TM = tm_opts[0]
        TK = 128
        for tk in (2048, 1024, 512, 256, 128):
            if tile_bytes(TM, tk, True) <= _TILE_BUDGET:
                TK = tk
                break
        while tile_bytes(TM, TK, True) > _TILE_BUDGET and TM > 8:
            TM = max(8, TM // 2)

    # Guarantee >=2 parallel output tiles so both v7x TensorCores get work.
    if (Nn // TN) * _cdiv(M, TM) < 2 and M > 8:
        TM = max(8, _round_up(_cdiv(M, 2), 8))
    return TM, TN, TK


@functools.partial(jax.jit, static_argnames=("alpha", "out_dtype", "softmax_groups"))
def _matmul_core(A, Bp, biasp, res, *, alpha, out_dtype, softmax_groups=None):
    """out = act(A @ Bp + bias [+ res]) with optional fused channel LogSoftmax."""
    M, K = A.shape
    Kb, Nn = Bp.shape
    assert Kb == K, (K, Kb)
    has_res = res is not None
    out_bytes = jnp.dtype(out_dtype).itemsize

    if K < 8:                     # tiny contraction dims (toy-scale upsample matrices)
        A = jnp.pad(A, ((0, 0), (0, 8 - K)))
        Bp = jnp.pad(Bp, ((0, 8 - K), (0, 0)))
        K = 8

    TM, TN, TK = _plan_gemm(M, K, Nn, has_res, out_bytes,
                            force_full_n=softmax_groups is not None)

    A = A.astype(jnp.bfloat16)
    Bp = Bp.astype(jnp.bfloat16)
    biasp = biasp.astype(jnp.float32)

    if TK >= K:
        # Single K step: full weight tile resident; no accumulator scratch.
        # Grid order (N-tiles, M-tiles) keeps the weight block index constant
        # across the inner M loop -> no repeated weight DMA.
        TK = K
        inputs = [A, Bp, biasp]
        in_specs = [
            pl.BlockSpec((TM, K), lambda j, i: (i, 0)),
            pl.BlockSpec((K, TN), lambda j, i: (0, j)),
            pl.BlockSpec((1, TN), lambda j, i: (0, j)),
        ]
        if has_res:
            inputs.append(res.astype(jnp.bfloat16))
            in_specs.append(pl.BlockSpec((TM, TN), lambda j, i: (i, j)))
        return pl.pallas_call(
            _make_matmul_kernel(float(alpha), has_res, True, softmax_groups),
            out_shape=jax.ShapeDtypeStruct((M, Nn), out_dtype),
            grid_spec=pltpu.PrefetchScalarGridSpec(
                num_scalar_prefetch=0,
                grid=(Nn // TN, pl.cdiv(M, TM)),
                in_specs=in_specs,
                out_specs=pl.BlockSpec((TM, TN), lambda j, i: (i, j)),
            ),
            compiler_params=pltpu.CompilerParams(
                dimension_semantics=("parallel", "parallel"),
                vmem_limit_bytes=_VMEM_LIMIT),
        )(*inputs)

    # ---- split-K fallback (accumulator scratch); not taken in this network ----
    Kp = _round_up(K, TK)
    A = jnp.pad(A, ((0, 0), (0, Kp - K)))
    Bp = jnp.pad(Bp, ((0, Kp - K), (0, 0)))
    inputs = [A, Bp, biasp]
    in_specs = [
        pl.BlockSpec((TM, TK), lambda j, i, k: (i, k)),
        pl.BlockSpec((TK, TN), lambda j, i, k: (k, j)),
        pl.BlockSpec((1, TN), lambda j, i, k: (0, j)),
    ]
    if has_res:
        inputs.append(res.astype(jnp.bfloat16))
        in_specs.append(pl.BlockSpec((TM, TN), lambda j, i, k: (i, j)))
    return pl.pallas_call(
        _make_matmul_kernel(float(alpha), has_res, False, softmax_groups),
        out_shape=jax.ShapeDtypeStruct((M, Nn), out_dtype),
        grid_spec=pltpu.PrefetchScalarGridSpec(
            num_scalar_prefetch=0,
            grid=(Nn // TN, pl.cdiv(M, TM), Kp // TK),
            in_specs=in_specs,
            out_specs=pl.BlockSpec((TM, TN), lambda j, i, k: (i, j)),
            scratch_shapes=[pltpu.VMEM((TM, TN), jnp.float32)],
        ),
        compiler_params=pltpu.CompilerParams(
            dimension_semantics=("parallel", "parallel", "arbitrary"),
            vmem_limit_bytes=_VMEM_LIMIT),
    )(*inputs)


def pallas_matmul_plain(a, b):
    """Plain a @ b (no bias / activation), exact shapes, bf16 MXU / f32 accumulate."""
    b = jnp.asarray(b)
    Nn = b.shape[1]
    bias = jnp.zeros((1, Nn), jnp.float32)
    return _matmul_core(a, b, bias, None, alpha=1.0, out_dtype=jnp.bfloat16)


# ----------------------------------------------------------------------------
# Convolution (NHWC) on top of the Pallas GEMM
# ----------------------------------------------------------------------------

def _im2col_nhwc(x, kh, kw, stride, padding, dilation):
    # NHWC im2col: concat along channels -> (N*Ho*Wo, kh*kw*Cin), no transposes.
    # TODO(synk): replace with an implicit-GEMM tap-accumulated reduction.
    N, H, W, C = x.shape
    xp = jnp.pad(x, ((0, 0), (padding, padding), (padding, padding), (0, 0)))
    Ho = (H + 2 * padding - dilation * (kh - 1) - 1) // stride + 1
    Wo = (W + 2 * padding - dilation * (kw - 1) - 1) // stride + 1
    cols = []
    for i in range(kh):
        for j in range(kw):
            hs, ws = i * dilation, j * dilation
            cols.append(xp[:, hs:hs + stride * (Ho - 1) + 1:stride,
                               ws:ws + stride * (Wo - 1) + 1:stride, :])
    col = jnp.concatenate(cols, axis=-1)             # (N, Ho, Wo, kh*kw*C)
    return col.reshape(N * Ho * Wo, kh * kw * C), Ho, Wo


def conv2d(x, pk, stride=1, padding=0, dilation=1, alpha=1.0, residual=None,
           out_dtype=jnp.bfloat16, softmax_groups=None):
    """PyTorch-semantics Conv2d (+BN folded, +bias, +activation, +residual) in NHWC."""
    N, H, W, Cin = x.shape
    if pk.kh == 1 and pk.kw == 1 and padding == 0:
        xs = x[:, ::stride, ::stride, :] if stride != 1 else x
        Ho, Wo = xs.shape[1], xs.shape[2]
        A = xs.reshape(N * Ho * Wo, Cin)
    else:
        A, Ho, Wo = _im2col_nhwc(x, pk.kh, pk.kw, stride, padding, dilation)
    res2 = None if residual is None else residual.reshape(N * Ho * Wo,
                                                          residual.shape[-1])
    out = _matmul_core(A, pk.w, pk.b, res2, alpha=float(alpha),
                       out_dtype=out_dtype, softmax_groups=softmax_groups)
    return out.reshape(N, Ho, Wo, pk.cout)


# ----------------------------------------------------------------------------
# Max-pool 3x3/s2/p1 (lane-dense elementwise max kernel over (rows, Wo*C))
# ----------------------------------------------------------------------------

@functools.lru_cache(maxsize=None)
def _make_max_kernel(n):
    def kernel(*refs):
        o_ref = refs[n]
        r = refs[0][...]
        for i in range(1, n):
            r = jnp.maximum(r, refs[i][...])
        o_ref[...] = r
    return kernel


def _tiled_max(mats):
    n = len(mats)
    R, L = mats[0].shape
    TR = R if R <= 8 else min(512, _round_up(R, 8))
    while TR > 8 and 2 * (n + 1) * TR * L * 2 > _TILE_BUDGET // 2:
        TR //= 2
    spec = pl.BlockSpec((TR, L), lambda i: (i, 0))
    return pl.pallas_call(
        _make_max_kernel(n),
        out_shape=jax.ShapeDtypeStruct((R, L), mats[0].dtype),
        grid_spec=pltpu.PrefetchScalarGridSpec(
            num_scalar_prefetch=0,
            grid=(pl.cdiv(R, TR),),
            in_specs=[spec] * n,
            out_specs=spec,
        ),
        compiler_params=pltpu.CompilerParams(
            dimension_semantics=("parallel",),
            vmem_limit_bytes=_VMEM_LIMIT),
    )(*mats)


def maxpool2d_3x3_s2_p1(x):   # NHWC
    # TODO(synk): the 9 shifted windows are still gathered by XLA strided slices.
    N, H, W, C = x.shape
    neg = float(jnp.finfo(x.dtype).min)
    xp = jnp.pad(x, ((0, 0), (1, 1), (1, 1), (0, 0)), constant_values=neg)
    Ho = (H - 1) // 2 + 1
    Wo = (W - 1) // 2 + 1
    slices = [xp[:, i:i + 2 * (Ho - 1) + 1:2,
                    j:j + 2 * (Wo - 1) + 1:2, :].reshape(N * Ho, Wo * C)
              for i in range(3) for j in range(3)]
    out = _tiled_max(slices)                          # (N*Ho, Wo*C), lane-dense
    return out.reshape(N, Ho, Wo, C)


# ----------------------------------------------------------------------------
# Adaptive avg-pool / separable bilinear upsample (MXU matmuls, no transposes
# for the pooling path)
# ----------------------------------------------------------------------------

def adaptive_avg_pool_nhwc(x, s):
    N, H, W, C = x.shape
    P = np.zeros((s * s, H * W), np.float32)          # (out cell, pixel) weights
    for oh in range(s):
        h0, h1 = (oh * H) // s, ((oh + 1) * H + s - 1) // s
        for ow in range(s):
            w0, w1 = (ow * W) // s, ((ow + 1) * W + s - 1) // s
            inv = 1.0 / ((h1 - h0) * (w1 - w0))
            for hh in range(h0, h1):
                for ww in range(w0, w1):
                    P[oh * s + ow, hh * W + ww] = inv
    # Block-diagonal over the batch -> one GEMM, feature map consumed directly
    # in (pixels, C) layout (channels stay lane-dense, no transpose).
    Pb = np.kron(np.eye(N, dtype=np.float32), P)      # (N*s*s, N*H*W)
    out = _matmul_core(jnp.asarray(Pb), x.reshape(N * H * W, C),
                       jnp.zeros((1, C), jnp.float32), None,
                       alpha=1.0, out_dtype=jnp.bfloat16)
    return out.reshape(N, s, s, C)


def _bilinear_1d(in_size, out_size):
    U = np.zeros((out_size, in_size), np.float32)
    if in_size == 1:
        U[:, 0] = 1.0
        return U
    scale = in_size / out_size
    for o in range(out_size):
        src = max((o + 0.5) * scale - 0.5, 0.0)
        i0 = min(int(np.floor(src)), in_size - 1)
        i1 = min(i0 + 1, in_size - 1)
        frac = src - i0
        U[o, i0] += 1.0 - frac
        U[o, i1] += frac
    return U


def bilinear_upsample_nhwc(x, out_h, out_w):
    # Separable PyTorch bilinear (align_corners=False): two exact-K matmuls.
    # TODO(synk): replace with a fused NHWC 4-tap VPU kernel (no transposes).
    N, H, W, C = x.shape
    Uh = _bilinear_1d(H, out_h)                        # (OH, H)
    Uw = _bilinear_1d(W, out_w)                        # (OW, W)
    t = jnp.transpose(x, (0, 1, 3, 2)).reshape(N * H * C, W)
    t = pallas_matmul_plain(t, jnp.asarray(Uw.T))      # (N*H*C, OW)
    t = t.reshape(N, H, C, out_w)
    t = jnp.transpose(t, (0, 3, 2, 1)).reshape(N * out_w * C, H)
    t = pallas_matmul_plain(t, jnp.asarray(Uh.T))      # (N*OW*C, OH)
    t = t.reshape(N, out_w, C, out_h)
    return jnp.transpose(t, (0, 3, 1, 2))              # (N, OH, OW, C)


# ----------------------------------------------------------------------------
# Parameter initialization (deterministic, synthetic) + packing
# ----------------------------------------------------------------------------

class KeyGen:
    def __init__(self, key):
        self.key = key

    def __call__(self):
        self.key, sub = jax.random.split(self.key)
        return sub


def _he(key, shape, fan_in):
    return (jnp.sqrt(2.0 / fan_in) * jax.random.normal(key, shape)).astype(jnp.float32)


def _raw_conv(kg, cin, cout, k, bias=True):
    w = _he(kg(), (cout, cin, k, k), cin * k * k)
    b = (0.01 * jax.random.normal(kg(), (cout,))).astype(jnp.float32) if bias \
        else jnp.zeros((cout,), jnp.float32)
    return w, b


def init_conv_bn(kg, cin, cout, k):
    # Conv (no bias) followed by eval-mode BatchNorm, folded into w/b.
    w = _he(kg(), (cout, cin, k, k), cin * k * k)
    gamma = 1.0 + 0.1 * jax.random.normal(kg(), (cout,))
    beta = 0.1 * jax.random.normal(kg(), (cout,))
    mean = 0.1 * jax.random.normal(kg(), (cout,))
    var = 1.0 + 0.1 * jnp.abs(jax.random.normal(kg(), (cout,)))
    scale = gamma / jnp.sqrt(var + 1e-5)
    return pack_conv((w * scale[:, None, None, None]).astype(jnp.float32),
                     (beta - mean * scale).astype(jnp.float32))


def init_conv(kg, cin, cout, k, bias=True):
    w, b = _raw_conv(kg, cin, cout, k, bias)
    return pack_conv(w, b)


def init_params(kg):
    params = {}
    rn = {"conv1": init_conv_bn(kg, 3, 64, 7), "layers": []}
    inplanes = 64
    for planes, nblocks, stride, dilation in LAYER_CFG:
        blocks = []
        for bi in range(nblocks):
            cin = inplanes if bi == 0 else planes
            bp = {"c1": init_conv_bn(kg, cin, planes, 3),
                  "c2": init_conv_bn(kg, planes, planes, 3)}
            if bi == 0 and (stride != 1 or inplanes != planes):
                bp["down"] = init_conv_bn(kg, inplanes, planes, 1)
            blocks.append(bp)
        inplanes = planes
        rn["layers"].append(blocks)
    params["resnet"] = rn
    params["psp"] = {
        "stages": [init_conv(kg, 512, 512, 1, bias=False) for _ in PSP_SIZES],
        "bottleneck": init_conv(kg, 512 * (len(PSP_SIZES) + 1), 1024, 1),
    }
    params["up1"] = init_conv(kg, 1024, 256, 3)
    params["up2"] = init_conv(kg, 256, 64, 3)
    params["up3"] = init_conv(kg, 64, 64, 3)
    # Fused 1x1 heads: feat (64->32) and seg (64->22) share one GEMM + epilogue.
    wf, bf_ = _raw_conv(kg, 64, N_FEAT, 1)
    ws, bs_ = _raw_conv(kg, 64, N_CLASSES, 1)
    params["heads"] = pack_conv(jnp.concatenate([wf, ws], axis=0),
                                jnp.concatenate([bf_, bs_], axis=0))
    return params


# ----------------------------------------------------------------------------
# Forward pass (NHWC internally, NCHW at the boundaries)
# ----------------------------------------------------------------------------

def basic_block(x, bp, stride, dilation):
    out = conv2d(x, bp["c1"], stride=stride, padding=dilation,
                 dilation=dilation, alpha=0.0)                    # conv+bn+relu
    if "down" in bp:
        residual = conv2d(x, bp["down"], stride=stride, padding=0, alpha=1.0)
    else:
        residual = x
    # conv+bn with fused (residual add + ReLU) epilogue
    return conv2d(out, bp["c2"], stride=1, padding=dilation,
                  dilation=dilation, alpha=0.0, residual=residual)


def resnet34_forward(x, rn):
    x = conv2d(x, rn["conv1"], stride=2, padding=3, alpha=0.0)
    x = maxpool2d_3x3_s2_p1(x)
    feats = []
    for li, (_, _, stride, dilation) in enumerate(LAYER_CFG):
        for bi, bp in enumerate(rn["layers"][li]):
            s = stride if bi == 0 else 1
            d = 1 if bi == 0 else dilation
            x = basic_block(x, bp, s, d)
        feats.append(x)
    return feats[3], feats[2]          # (f: 512ch, class_f: 256ch)


def psp_module(feats, pp):
    N, H, W, C = feats.shape
    priors = []
    for size, st in zip(PSP_SIZES, pp["stages"]):
        pooled = adaptive_avg_pool_nhwc(feats, size)
        conv = conv2d(pooled, st, alpha=1.0)
        priors.append(bilinear_upsample_nhwc(conv, H, W))
    priors.append(feats)
    cat = jnp.concatenate(priors, axis=-1)
    return conv2d(cat, pp["bottleneck"], alpha=0.0)               # + ReLU


def psp_upsample(x, up):
    N, H, W, C = x.shape
    h2 = bilinear_upsample_nhwc(x, 2 * H, 2 * W)
    return conv2d(h2, up, stride=1, padding=1, alpha=0.25)        # PReLU(0.25)


def modified_resnet_forward(x_nchw, params):
    x = jnp.transpose(x_nchw, (0, 2, 3, 1)).astype(jnp.bfloat16)  # NCHW -> NHWC
    f, _class_f = resnet34_forward(x, params["resnet"])
    p = psp_module(f, params["psp"])          # drop_1: identity (inference)
    p = psp_upsample(p, params["up1"])        # drop_2: identity
    p = psp_upsample(p, params["up2"])        # drop_2: identity
    p = psp_upsample(p, params["up3"])
    # 1x1 heads GEMM with both channel LogSoftmaxes fused into its epilogue.
    heads = conv2d(p, params["heads"], alpha=1.0, out_dtype=jnp.float32,
                   softmax_groups=((0, N_FEAT), (N_FEAT, N_FEAT + N_CLASSES)))
    feat = jnp.transpose(heads[..., :N_FEAT], (0, 3, 1, 2))
    seg = jnp.transpose(heads[..., N_FEAT:N_FEAT + N_CLASSES], (0, 3, 1, 2))
    return feat, seg


# ----------------------------------------------------------------------------

if __name__ == "__main__":
    root = jax.random.PRNGKey(0)
    params = init_params(KeyGen(jax.random.fold_in(root, 1)))
    x = jax.random.normal(jax.random.fold_in(root, 2), (2, 3, 32, 32), jnp.float32)

    fwd = jax.jit(modified_resnet_forward)
    feat, seg = fwd(x, params)
    jax.block_until_ready((feat, seg))

    assert feat.shape == (2, N_FEAT, 32, 32), feat.shape
    assert seg.shape == (2, N_CLASSES, 32, 32), seg.shape
    assert bool(jnp.isfinite(feat).all()) and bool(jnp.isfinite(seg).all())
    # log-softmax sanity: exp over channel dim sums to 1 for both heads
    assert bool(jnp.allclose(jnp.exp(seg).sum(axis=1), 1.0, atol=1e-3))
    assert bool(jnp.allclose(jnp.exp(feat).sum(axis=1), 1.0, atol=1e-3))
    print("KERNEL_OK")
</pallas_src>

<mosaic_0001>
module attributes {stable_mosaic.version = 11 : i64} {
  func.func @kernel(%arg0: i32, %arg1: i32, %arg2: memref<256x147xbf16, #tpu.memory_space<vmem>>, %arg3: memref<147x64xbf16, #tpu.memory_space<vmem>>, %arg4: memref<1x64xf32, #tpu.memory_space<vmem>>, %arg5: memref<256x64xbf16, #tpu.memory_space<vmem>>) attributes {dimension_semantics = [#tpu.dimension_semantics<parallel>, #tpu.dimension_semantics<parallel>], iteration_bounds = array<i64: 1, 2>, scalar_prefetch = 0 : i64, scratch_operands = 0 : i64, tpu.core_type = #tpu.core_type<tc>, window_params = [{transform_indices = @transform_0, window_bounds = array<i64: 256, 147>}, {transform_indices = @transform_1, window_bounds = array<i64: 147, 64>}, {transform_indices = @transform_2, window_bounds = array<i64: 1, 64>}, {transform_indices = @transform_3, window_bounds = array<i64: 256, 64>}]} {
    %c0 = arith.constant 0 : index
    %c0_0 = arith.constant 0 : index
    %0 = vector.load %arg2[%c0, %c0_0] : memref<256x147xbf16, #tpu.memory_space<vmem>>, vector<256x147xbf16>
    %c0_1 = arith.constant 0 : index
    %c0_2 = arith.constant 0 : index
    %1 = vector.load %arg3[%c0_1, %c0_2] : memref<147x64xbf16, #tpu.memory_space<vmem>>, vector<147x64xbf16>
    %cst = arith.constant dense<0.000000e+00> : vector<256x64xf32>
    %2 = tpu.matmul %0, %1, %cst {dimension_numbers = #tpu.dot_dimension_numbers<[1], [0], [0], [1], [0, 0, 1, 1], [], []>} : vector<256x147xbf16>, vector<147x64xbf16>, vector<256x64xf32> -> vector<256x64xf32>
    %c0_3 = arith.constant 0 : index
    %c0_4 = arith.constant 0 : index
    %3 = vector.load %arg4[%c0_3, %c0_4] : memref<1x64xf32, #tpu.memory_space<vmem>>, vector<1x64xf32>
    %4 = vector.broadcast %3 : vector<1x64xf32> to vector<256x64xf32>
    %5 = arith.addf %2, %4 : vector<256x64xf32>
    %cst_5 = arith.constant 0.000000e+00 : f32
    %6 = vector.broadcast %cst_5 : f32 to vector<256x64xf32>
    %7 = arith.maximumf %5, %6 : vector<256x64xf32>
    %8 = arith.truncf %7 : vector<256x64xf32> to vector<256x64xbf16>
    %c0_6 = arith.constant 0 : index
    %c0_7 = arith.constant 0 : index
    %9 = vector.load %arg5[%c0_6, %c0_7] : memref<256x64xbf16, #tpu.memory_space<vmem>>, vector<256x64xbf16>
    tpu.vector_store %arg5[%c0_6, %c0_7], %8 {strides = array<i32>} : memref<256x64xbf16, #tpu.memory_space<vmem>>, vector<256x64xbf16>,
    return
  }
  func.func @transform_0(%arg0: i32, %arg1: i32) -> (i32, i32) {
    %c0_i32 = arith.constant 0 : i32
    %c0_i32_0 = arith.constant 0 : i32
    return %arg1, %c0_i32 : i32, i32
  }
  func.func @transform_1(%arg0: i32, %arg1: i32) -> (i32, i32) {
    %c0_i32 = arith.constant 0 : i32
    %c0_i32_0 = arith.constant 0 : i32
    return %c0_i32, %arg0 : i32, i32
  }
  func.func @transform_2(%arg0: i32, %arg1: i32) -> (i32, i32) {
    %c0_i32 = arith.constant 0 : i32
    %c0_i32_0 = arith.constant 0 : i32
    return %c0_i32, %arg0 : i32, i32
  }
  func.func @transform_3(%arg0: i32, %arg1: i32) -> (i32, i32) {
    %c0_i32 = arith.constant 0 : i32
    return %arg1, %arg0 : i32, i32
  }
}

</mosaic_0001>

<bundles_post_ra>
// kernel: _matmul_core.1
= control target key start
LH: loop header
LB: loop body
LE: loop exit
PB: predicated region body
PF: predicated region fallthrough
CT: control target
= control target key end

     0   :  { %s1288_s12 = smov 0   ;;  %s1290_s13 = smov 0   ;;  %s1508_s0 = inlined_call_operand.vmem [shape: bf16[512,147], index: 0, kind: input, shape index: {}]   ;;  %s1509_s1 = inlined_call_operand.vmem [shape: bf16[147,64], index: 1, kind: input, shape index: {}]   ;;  %s1510_s2 = inlined_call_operand.vmem [shape: f32[1,64], index: 2, kind: input, shape index: {}]   ;;  %s1511_s3 = inlined_call_operand.vmem [shape: bf16[512,64], index: 3, kind: output, shape index: {}]  }
   0x1   :  { %s1292_s14 = smov 0  }
   0x2 LB: > { %s22_s15 = sadd.s32 1, %s1260_s13  ;;  %p1006_p0 = scmp.ge.s32.totalorder %s1264_s14, 1  ;;  %s1264_s14 = sphi %s1292_s14, %s13_s14   ;;  %s1260_s13 = sphi %s1290_s13, %s1513_s13   ;;  %s1256_s12 = sphi %s1288_s12, %s1512_s12  }
   0x3   : > { %p23_p1 = scmp.ge.s32.totalorder %s22_s15, 2  ;;  %p170_p2 = scmp.lt.s32.totalorder %s1264_s14, 3 }
   0x5   : > { %s1515_s15 = smov (%p23_p1, %s22_s15), 0  ;;  %p171_p3 = pnand %p1006_p0, %p170_p2 }
   0x6   : > { %s1007_s22 = sshll.u32 (!%p171_p3), %s1256_s12, 5 }
   0x7   : > { %174 = sbr.rel (%p171_p3) target bundleno = 313 (0x139), region = 32  ;;  %p206_p4 = scmp.lt.s32.totalorder (!%p171_p3), %s1007_s22, 63 }
   0xc   : > { %v1184_v0 = vld [vmem:[%s1509_s1 + $0x38] sm:$0xff]   ;;  %v1266_v1 = vmov 0   ;;  %v1185_v2 = vld [vmem:[%s1509_s1 + $0x30] sm:$0xff]   ;;  %v1186_v3 = vld [vmem:[%s1509_s1 + $0x28] sm:$0xff]   ;;  %s1517_s22 = smov (!%p206_p4, %s1007_s22), 63  ;;  %vm488_vm0 = vcmask 154624  }
   0xd   : > { %544 = vmatprep.subr.bf16.mxu0 %v1266_v1  ;;  %1138 = vmatprep.subr.bf16.mxu1 %v1266_v1  ;;  %v1187_v4 = vld [vmem:[%s1509_s1 + $0x20] sm:$0xff]   ;;  %s1105_s25 = sshll.u32 %s1517_s22, 3  ;;  %v1188_v5 = vld [vmem:[%s1509_s1 + $0x18] sm:$0xff]   ;;  %v1189_v8 = vld [vmem:[%s1509_s1 + $0x10] sm:$0xff]   ;;  %vm537_vm1 = vcmask 1040384   ;;  %vm538_vm2 = vcmask 1041408  }
   0xe   : > { %545 = vmatpush1.bf16.msra.mxu0 %v1184_v0  ;;  %1148 = vmatpush1.bf16.msra.mxu1 %v1184_v0  ;;  %s1324_s28 = scalar_lea.vmem %s1508_s0, %s1105_s25  ;;  %v1190_v9 = vld [vmem:[%s1509_s1 + $0x8] sm:$0xff]   ;;  %v1267_v10 = vmov 65535   ;;  %v1191_v12 = vld [vmem:[%s1509_s1] sm:$0xff]   ;;  %s1011_s19 = sshll.u32 %s1517_s22, 2  ;;  %vm865_vm3 = vcmask 519168  }
   0xf   : > { %546 = vmatprep.subr.bf16.mxu0 %v1266_v1  ;;  %1139 = vmatprep.subr.bf16.mxu1 %v1266_v1  ;;  %v1196_v6 = vld [vmem:[%s1324_s28 + $0x4] ss:$8 sps:$4 sm:$0xff]   ;;  %v539_v11 = vsel %vm537_vm1, 4294967295, %v1267_v10  ;;  %v1192_v13 = vld [vmem:[%s1509_s1 + $0x48] ss:$0 sps:$4 sm:$0x33]   ;;  %s1403_s23 = scalar_lea.vmem %s1511_s3, %s1011_s19 }
  0x10   : > { %v1199_v7 = vld [vmem:[%s1324_s28 + $0x84] ss:$8 sps:$4 sm:$0xff]   ;;  %1055 = vmatprep.mubr.msk.bf16.mxu0 %vm488_vm0, %v1196_v6  ;;  %v540_v14 = vsel %vm538_vm2, %v539_v11, 0  ;;  %v1194_v17 = vld [vmem:[%s1324_s28] ss:$8 sps:$4 sm:$0xff]  }
  0x11   : > { %1063 = vmatprep.mubr.msk.bf16.mxu1 %vm488_vm0, %v1199_v7  ;;  %v542_v15 = vand.u32 %v1192_v13, %v540_v14  ;;  %v1193_v16 = vld [vmem:[%s1509_s1 + $0x40] sm:$0xff]   ;;  %v1200_v19 = vld [vmem:[%s1324_s28 + $0x14] ss:$8 sps:$4 sm:$0xff]   ;;  %v1204_v21 = vld [vmem:[%s1324_s28 + $0x10] ss:$8 sps:$4 sm:$0xff]  }
  0x12   : > { %547 = vmatpush1.bf16.msra.mxu0 %v1185_v2  ;;  %1149 = vmatpush1.bf16.msra.mxu1 %v1185_v2  ;;  %v1197_v18 = vld [vmem:[%s1324_s28 + $0x80] ss:$8 sps:$4 sm:$0xff]   ;;  %v1202_v20 = vld [vmem:[%s1324_s28 + $0x94] ss:$8 sps:$4 sm:$0xff]   ;;  %v1205_v22 = vld [vmem:[%s1324_s28 + $0x90] ss:$8 sps:$4 sm:$0xff]  }
  0x13   : > { %548 = vmatprep.subr.bf16.mxu0 %v1266_v1  ;;  %1140 = vmatprep.subr.bf16.mxu1 %v1266_v1  ;;  %v1206_v23 = vld [vmem:[%s1324_s28 + $0x24] ss:$8 sps:$4 sm:$0xff]   ;;  %v1210_v25 = vld [vmem:[%s1324_s28 + $0x20] ss:$8 sps:$4 sm:$0xff]   ;;  %v1212_v27 = vld [vmem:[%s1324_s28 + $0x34] ss:$8 sps:$4 sm:$0xff]  }
  0x14   : > { %v1208_v24 = vld [vmem:[%s1324_s28 + $0xa4] ss:$8 sps:$4 sm:$0xff]   ;;  %v1211_v26 = vld [vmem:[%s1324_s28 + $0xa0] ss:$8 sps:$4 sm:$0xff]   ;;  %v1214_v28 = vld [vmem:[%s1324_s28 + $0xb4] ss:$8 sps:$4 sm:$0xff]  }
  0x15   : > { %v1216_v29 = vld [vmem:[%s1324_s28 + $0x30] ss:$8 sps:$4 sm:$0xff]   ;;  %v1218_v31 = vld [vmem:[%s1324_s28 + $0x44] ss:$8 sps:$4 sm:$0xff]   ;;  %v1222_v33 = vld [vmem:[%s1324_s28 + $0x40] ss:$8 sps:$4 sm:$0xff]  }
  0x16   : > { %549 = vmatpush1.bf16.msra.mxu0 %v1186_v3  ;;  %1150 = vmatpush1.bf16.msra.mxu1 %v1186_v3  ;;  %v1217_v30 = vld [vmem:[%s1324_s28 + $0xb0] ss:$8 sps:$4 sm:$0xff]   ;;  %v1220_v32 = vld [vmem:[%s1324_s28 + $0xc4] ss:$8 sps:$4 sm:$0xff]   ;;  %v1223_v34 = vld [vmem:[%s1324_s28 + $0xc0] ss:$8 sps:$4 sm:$0xff]  }
  0x17   : > { %550 = vmatprep.subr.bf16.mxu0 %v1266_v1  ;;  %1141 = vmatprep.subr.bf16.mxu1 %v1266_v1  ;;  %v1224_v35 = vld [vmem:[%s1324_s28 + $0x54] ss:$8 sps:$4 sm:$0xff]   ;;  %v1228_v37 = vld [vmem:[%s1324_s28 + $0x50] ss:$8 sps:$4 sm:$0xff]   ;;  %v1230_v39 = vld [vmem:[%s1324_s28 + $0x64] ss:$8 sps:$4 sm:$0xff]  }
  0x18   : > { %v1226_v36 = vld [vmem:[%s1324_s28 + $0xd4] ss:$8 sps:$4 sm:$0xff]   ;;  %v1229_v38 = vld [vmem:[%s1324_s28 + $0xd0] ss:$8 sps:$4 sm:$0xff]   ;;  %v1232_v40 = vld [vmem:[%s1324_s28 + $0xe4] ss:$8 sps:$4 sm:$0xff]  }
  0x19   : > { %v1234_v41 = vld [vmem:[%s1324_s28 + $0x60] ss:$8 sps:$4 sm:$0xff]   ;;  %v1236_v43 = vld [vmem:[%s1324_s28 + $0x74] ss:$8 sps:$4 sm:$0xff]   ;;  %v1240_v45 = vld [vmem:[%s1324_s28 + $0x70] ss:$8 sps:$4 sm:$0xff]  }
  0x1a   : > { %551 = vmatpush1.bf16.msra.mxu0 %v1187_v4  ;;  %1151 = vmatpush1.bf16.msra.mxu1 %v1187_v4  ;;  %v1235_v42 = vld [vmem:[%s1324_s28 + $0xe0] ss:$8 sps:$4 sm:$0xff]   ;;  %v1238_v44 = vld [vmem:[%s1324_s28 + $0xf4] ss:$8 sps:$4 sm:$0xff]   ;;  %v1241_v46 = vld [vmem:[%s1324_s28 + $0xf0] ss:$8 sps:$4 sm:$0xff]  }
  0x1b   : > { %552 = vmatprep.subr.bf16.mxu0 %v1266_v1  ;;  %1142 = vmatprep.subr.bf16.mxu1 %v1266_v1  ;;  %v1395_v47 = vld [vmem:[%s1510_s2] ss:$0 sm:$0xff] }
  0x1e   : > { %553 = vmatpush1.bf16.msra.mxu0 %v1188_v5  ;;  %1152 = vmatpush1.bf16.msra.mxu1 %v1188_v5 }
  0x1f   : > { %554 = vmatprep.subr.bf16.mxu0 %v1266_v1  ;;  %1143 = vmatprep.subr.bf16.mxu1 %v1266_v1 }
  0x22   : > { %555 = vmatpush1.bf16.msra.mxu0 %v1189_v8  ;;  %1153 = vmatpush1.bf16.msra.mxu1 %v1189_v8 }
  0x23   : > { %556 = vmatprep.subr.bf16.mxu0 %v1266_v1  ;;  %1144 = vmatprep.subr.bf16.mxu1 %v1266_v1 }
  0x26   : > { %557 = vmatpush1.bf16.msra.mxu0 %v1190_v9  ;;  %1154 = vmatpush1.bf16.msra.mxu1 %v1190_v9 }
  0x27   : > { %558 = vmatprep.subr.bf16.mxu0 %v1266_v1  ;;  %1145 = vmatprep.subr.bf16.mxu1 %v1266_v1 }
  0x2a   : > { %559 = vmatpush1.bf16.msra.mxu0 %v1191_v12  ;;  %1155 = vmatpush1.bf16.msra.mxu1 %v1191_v12 }
  0x2b   : > { %572 = vmatprep.subr.bf16.mxu0 %v1266_v1  ;;  %1146 = vmatprep.subr.bf16.mxu1 %v1266_v1 }
  0x2e   : > { %573 = vmatpush2.bf16.msra.mxu0 %v542_v15  ;;  %1156 = vmatpush2.bf16.msra.mxu1 %v542_v15 }
  0x2f   : > { %574 = vmatprep.subr.bf16.mxu0 %v1266_v1  ;;  %1147 = vmatprep.subr.bf16.mxu1 %v1266_v1 }
  0x32   : > { %575 = vmatpush2.bf16.msra.mxu0 %v1193_v16  ;;  %1157 = vmatpush2.bf16.msra.mxu1 %v1193_v16 }
  0x35   : > { %577 = vmatmul.mubr.bf16.vlgmr.msra.gmra.mxu0 %v1194_v17  ;;  %641 = vmatmul.mubr.bf16.vlgmr.msra.gmra.mxu1 %v1197_v18 }
  0x36   : > { %1056 = vmatprep.mubr.msk.bf16.mxu0 %vm488_vm0, %v1200_v19  ;;  %1064 = vmatprep.mubr.msk.bf16.mxu1 %vm488_vm0, %v1202_v20 }
  0x3d   : > { %585 = vmatmul.mubr.bf16.gmra.mxu0 %v1204_v21  ;;  %649 = vmatmul.mubr.bf16.gmra.mxu1 %v1205_v22 }
  0x3e   : > { %1057 = vmatprep.mubr.msk.bf16.mxu0 %vm488_vm0, %v1206_v23  ;;  %1065 = vmatprep.mubr.msk.bf16.mxu1 %vm488_vm0, %v1208_v24 }
  0x45   : > { %593 = vmatmul.mubr.bf16.gmra.mxu0 %v1210_v25  ;;  %657 = vmatmul.mubr.bf16.gmra.mxu1 %v1211_v26 }
  0x46   : > { %1058 = vmatprep.mubr.msk.bf16.mxu0 %vm488_vm0, %v1212_v27  ;;  %1066 = vmatprep.mubr.msk.bf16.mxu1 %vm488_vm0, %v1214_v28 }
  0x4d   : > { %601 = vmatmul.mubr.bf16.gmra.mxu0 %v1216_v29  ;;  %665 = vmatmul.mubr.bf16.gmra.mxu1 %v1217_v30 }
  0x4e   : > { %1059 = vmatprep.mubr.msk.bf16.mxu0 %vm488_vm0, %v1218_v31  ;;  %1067 = vmatprep.mubr.msk.bf16.mxu1 %vm488_vm0, %v1220_v32 }
  0x55   : > { %609 = vmatmul.mubr.bf16.gmra.mxu0 %v1222_v33  ;;  %673 = vmatmul.mubr.bf16.gmra.mxu1 %v1223_v34 }
  0x56   : > { %1060 = vmatprep.mubr.msk.bf16.mxu0 %vm488_vm0, %v1224_v35  ;;  %1068 = vmatprep.mubr.msk.bf16.mxu1 %vm488_vm0, %v1226_v36 }
  0x5d   : > { %617 = vmatmul.mubr.bf16.gmra.mxu0 %v1228_v37  ;;  %681 = vmatmul.mubr.bf16.gmra.mxu1 %v1229_v38 }
  0x5e   : > { %1061 = vmatprep.mubr.msk.bf16.mxu0 %vm488_vm0, %v1230_v39  ;;  %1069 = vmatprep.mubr.msk.bf16.mxu1 %vm488_vm0, %v1232_v40 }
  0x65   : > { %625 = vmatmul.mubr.bf16.gmra.mxu0 %v1234_v41  ;;  %689 = vmatmul.mubr.bf16.gmra.mxu1 %v1235_v42 }
  0x66   : > { %1062 = vmatprep.mubr.msk.bf16.mxu0 %vm488_vm0, %v1236_v43  ;;  %1070 = vmatprep.mubr.msk.bf16.mxu1 %vm488_vm0, %v1238_v44 }
  0x6d   : > { %633 = vmatmul.mubr.bf16.gmra.mxu0 %v1240_v45  ;;  %697 = vmatmul.mubr.bf16.gmra.mxu1 %v1241_v46 }
  0xf5   : > { %v578_v48 = vpop.f32.mrf.mxu0  ;;  %v642_v49 = vpop.f32.mrf.mxu1 }
  0xf6   : > { %v579_v50 = vadd.f32 %v1395_v47, %v578_v48  ;;  %v643_v51 = vadd.f32 %v1395_v47, %v642_v49 }
  0xf7   : > { %v580_v52 = vpop.f32.mrf.mxu0  ;;  %v644_v53 = vpop.f32.mrf.mxu1 }
  0xf8   : > { %v705_v54 = vmax.f32 %v579_v50, 0.0  ;;  %v721_v55 = vmax.f32 %v643_v51, 0.0 }
  0xf9   : > { %v581_v56 = vpop.f32.mrf.mxu0  ;;  %v645_v57 = vpop.f32.mrf.mxu1 }
  0xfa   : > { %v1106_v58 = vpack.c.bf16 %v705_v54, %v705_v54  ;;  %v1122_v59 = vpack.c.bf16 %v721_v55, %v721_v55  ;;  %v582_v60 = vadd.f32 %v1395_v47, %v581_v56  ;;  %v646_v61 = vadd.f32 %v1395_v47, %v645_v57 }
  0xfb   : > { %v583_v62 = vpop.f32.mrf.mxu0  ;;  %v647_v63 = vpop.f32.mrf.mxu1 }
  0xfc   : > { %866 = vst.msk [vmem:[%s1403_s23] sm:$0xf] %vm865_vm3, %v1106_v58  ;;  %882 = vst.msk [vmem:[%s1403_s23 + $0x40] sm:$0xf] %vm865_vm3, %v1122_v59  ;;  %v706_v0 = vmax.f32 %v582_v60, 0.0  ;;  %v722_v1 = vmax.f32 %v646_v61, 0.0 }
  0xfd   : > { %v586_v2 = vpop.f32.mrf.mxu0  ;;  %v650_v3 = vpop.f32.mrf.mxu1 }
  0xfe   : > { %v1107_v4 = vpack.c.bf16 %v706_v0, %v706_v0  ;;  %v1123_v5 = vpack.c.bf16 %v722_v1, %v722_v1  ;;  %v587_v6 = vadd.f32 %v1395_v47, %v586_v2  ;;  %v651_v7 = vadd.f32 %v1395_v47, %v650_v3 }
  0xff   : > { %v588_v8 = vpop.f32.mrf.mxu0  ;;  %v652_v9 = vpop.f32.mrf.mxu1 }
 0x100   : > { %867 = vst.msk [vmem:[%s1403_s23 + $0x4] sm:$0xf] %vm865_vm3, %v1107_v4  ;;  %883 = vst.msk [vmem:[%s1403_s23 + $0x44] sm:$0xf] %vm865_vm3, %v1123_v5  ;;  %v707_v10 = vmax.f32 %v587_v6, 0.0  ;;  %v723_v11 = vmax.f32 %v651_v7, 0.0 }
 0x101   : > { %v589_v12 = vpop.f32.mrf.mxu0  ;;  %v653_v13 = vpop.f32.mrf.mxu1 }
 0x102   : > { %v1108_v14 = vpack.c.bf16 %v707_v10, %v707_v10  ;;  %v1124_v15 = vpack.c.bf16 %v723_v11, %v723_v11  ;;  %v590_v16 = vadd.f32 %v1395_v47, %v589_v12  ;;  %v654_v17 = vadd.f32 %v1395_v47, %v653_v13 }
 0x103   : > { %v591_v18 = vpop.f32.mrf.mxu0  ;;  %v655_v19 = vpop.f32.mrf.mxu1 }
 0x104   : > { %868 = vst.msk [vmem:[%s1403_s23 + $0x8] sm:$0xf] %vm865_vm3, %v1108_v14  ;;  %884 = vst.msk [vmem:[%s1403_s23 + $0x48] sm:$0xf] %vm865_vm3, %v1124_v15  ;;  %v708_v20 = vmax.f32 %v590_v16, 0.0  ;;  %v724_v21 = vmax.f32 %v654_v17, 0.0 }
 0x105   : > { %v594_v22 = vpop.f32.mrf.mxu0  ;;  %v658_v23 = vpop.f32.mrf.mxu1 }
 0x106   : > { %v1109_v24 = vpack.c.bf16 %v708_v20, %v708_v20  ;;  %v1125_v25 = vpack.c.bf16 %v724_v21, %v724_v21  ;;  %v595_v26 = vadd.f32 %v1395_v47, %v594_v22  ;;  %v659_v27 = vadd.f32 %v1395_v47, %v658_v23 }
 0x107   : > { %v596_v28 = vpop.f32.mrf.mxu0  ;;  %v660_v29 = vpop.f32.mrf.mxu1 }
 0x108   : > { %869 = vst.msk [vmem:[%s1403_s23 + $0xc] sm:$0xf] %vm865_vm3, %v1109_v24  ;;  %885 = vst.msk [vmem:[%s1403_s23 + $0x4c] sm:$0xf] %vm865_vm3, %v1125_v25  ;;  %v709_v30 = vmax.f32 %v595_v26, 0.0  ;;  %v725_v31 = vmax.f32 %v659_v27, 0.0 }
 0x109   : > { %v597_v32 = vpop.f32.mrf.mxu0  ;;  %v661_v33 = vpop.f32.mrf.mxu1 }
 0x10a   : > { %v1110_v34 = vpack.c.bf16 %v709_v30, %v709_v30  ;;  %v1126_v35 = vpack.c.bf16 %v725_v31, %v725_v31  ;;  %v598_v36 = vadd.f32 %v1395_v47, %v597_v32  ;;  %v662_v37 = vadd.f32 %v1395_v47, %v661_v33 }
 0x10b   : > { %v599_v38 = vpop.f32.mrf.mxu0  ;;  %v663_v39 = vpop.f32.mrf.mxu1 }
 0x10c   : > { %870 = vst.msk [vmem:[%s1403_s23 + $0x10] sm:$0xf] %vm865_vm3, %v1110_v34  ;;  %886 = vst.msk [vmem:[%s1403_s23 + $0x50] sm:$0xf] %vm865_vm3, %v1126_v35  ;;  %v710_v40 = vmax.f32 %v598_v36, 0.0  ;;  %v726_v41 = vmax.f32 %v662_v37, 0.0 }
 0x10d   : > { %v602_v42 = vpop.f32.mrf.mxu0  ;;  %v666_v43 = vpop.f32.mrf.mxu1 }
 0x10e   : > { %v1111_v44 = vpack.c.bf16 %v710_v40, %v710_v40  ;;  %v1127_v45 = vpack.c.bf16 %v726_v41, %v726_v41  ;;  %v603_v46 = vadd.f32 %v1395_v47, %v602_v42  ;;  %v667_v48 = vadd.f32 %v1395_v47, %v666_v43 }
 0x10f   : > { %v604_v49 = vpop.f32.mrf.mxu0  ;;  %v668_v50 = vpop.f32.mrf.mxu1 }
 0x110   : > { %871 = vst.msk [vmem:[%s1403_s23 + $0x14] sm:$0xf] %vm865_vm3, %v1111_v44  ;;  %887 = vst.msk [vmem:[%s1403_s23 + $0x54] sm:$0xf] %vm865_vm3, %v1127_v45  ;;  %v711_v51 = vmax.f32 %v603_v46, 0.0  ;;  %v727_v52 = vmax.f32 %v667_v48, 0.0 }
 0x111   : > { %v605_v53 = vpop.f32.mrf.mxu0  ;;  %v669_v54 = vpop.f32.mrf.mxu1 }
 0x112   : > { %v1112_v55 = vpack.c.bf16 %v711_v51, %v711_v51  ;;  %v1128_v56 = vpack.c.bf16 %v727_v52, %v727_v52  ;;  %v606_v57 = vadd.f32 %v1395_v47, %v605_v53  ;;  %v670_v58 = vadd.f32 %v1395_v47, %v669_v54 }
 0x113   : > { %v607_v59 = vpop.f32.mrf.mxu0  ;;  %v671_v60 = vpop.f32.mrf.mxu1 }
 0x114   : > { %872 = vst.msk [vmem:[%s1403_s23 + $0x18] sm:$0xf] %vm865_vm3, %v1112_v55  ;;  %888 = vst.msk [vmem:[%s1403_s23 + $0x58] sm:$0xf] %vm865_vm3, %v1128_v56  ;;  %v712_v61 = vmax.f32 %v606_v57, 0.0  ;;  %v728_v62 = vmax.f32 %v670_v58, 0.0 }
 0x115   : > { %v610_v63 = vpop.f32.mrf.mxu0  ;;  %v674_v0 = vpop.f32.mrf.mxu1 }
 0x116   : > { %v1113_v1 = vpack.c.bf16 %v712_v61, %v712_v61  ;;  %v1129_v2 = vpack.c.bf16 %v728_v62, %v728_v62  ;;  %v611_v3 = vadd.f32 %v1395_v47, %v610_v63  ;;  %v675_v4 = vadd.f32 %v1395_v47, %v674_v0 }
 0x117   : > { %v612_v5 = vpop.f32.mrf.mxu0  ;;  %v676_v6 = vpop.f32.mrf.mxu1 }
 0x118   : > { %873 = vst.msk [vmem:[%s1403_s23 + $0x1c] sm:$0xf] %vm865_vm3, %v1113_v1  ;;  %889 = vst.msk [vmem:[%s1403_s23 + $0x5c] sm:$0xf] %vm865_vm3, %v1129_v2  ;;  %v713_v7 = vmax.f32 %v611_v3, 0.0  ;;  %v729_v8 = vmax.f32 %v675_v4, 0.0 }
 0x119   : > { %v613_v9 = vpop.f32.mrf.mxu0  ;;  %v677_v10 = vpop.f32.mrf.mxu1 }
 0x11a   : > { %v1114_v11 = vpack.c.bf16 %v713_v7, %v713_v7  ;;  %v1130_v12 = vpack.c.bf16 %v729_v8, %v729_v8  ;;  %v614_v13 = vadd.f32 %v1395_v47, %v613_v9  ;;  %v678_v14 = vadd.f32 %v1395_v47, %v677_v10 }
 0x11b   : > { %v615_v15 = vpop.f32.mrf.mxu0  ;;  %v679_v16 = vpop.f32.mrf.mxu1 }
 0x11c   : > { %874 = vst.msk [vmem:[%s1403_s23 + $0x20] sm:$0xf] %vm865_vm3, %v1114_v11  ;;  %890 = vst.msk [vmem:[%s1403_s23 + $0x60] sm:$0xf] %vm865_vm3, %v1130_v12  ;;  %v714_v17 = vmax.f32 %v614_v13, 0.0  ;;  %v730_v18 = vmax.f32 %v678_v14, 0.0 }
 0x11d   : > { %v618_v19 = vpop.f32.mrf.mxu0  ;;  %v682_v20 = vpop.f32.mrf.mxu1 }
 0x11e   : > { %v1115_v21 = vpack.c.bf16 %v714_v17, %v714_v17  ;;  %v1131_v22 = vpack.c.bf16 %v730_v18, %v730_v18  ;;  %v619_v23 = vadd.f32 %v1395_v47, %v618_v19  ;;  %v683_v24 = vadd.f32 %v1395_v47, %v682_v20 }
 0x11f   : > { %v620_v25 = vpop.f32.mrf.mxu0  ;;  %v684_v26 = vpop.f32.mrf.mxu1 }
 0x120   : > { %875 = vst.msk [vmem:[%s1403_s23 + $0x24] sm:$0xf] %vm865_vm3, %v1115_v21  ;;  %891 = vst.msk [vmem:[%s1403_s23 + $0x64] sm:$0xf] %vm865_vm3, %v1131_v22  ;;  %v715_v27 = vmax.f32 %v619_v23, 0.0  ;;  %v731_v28 = vmax.f32 %v683_v24, 0.0 }
 0x121   : > { %v621_v29 = vpop.f32.mrf.mxu0  ;;  %v685_v30 = vpop.f32.mrf.mxu1 }
 0x122   : > { %v1116_v31 = vpack.c.bf16 %v715_v27, %v715_v27  ;;  %v1132_v32 = vpack.c.bf16 %v731_v28, %v731_v28  ;;  %v622_v33 = vadd.f32 %v1395_v47, %v621_v29  ;;  %v686_v34 = vadd.f32 %v1395_v47, %v685_v30 }
 0x123   : > { %v623_v35 = vpop.f32.mrf.mxu0  ;;  %v687_v36 = vpop.f32.mrf.mxu1 }
 0x124   : > { %876 = vst.msk [vmem:[%s1403_s23 + $0x28] sm:$0xf] %vm865_vm3, %v1116_v31  ;;  %892 = vst.msk [vmem:[%s1403_s23 + $0x68] sm:$0xf] %vm865_vm3, %v1132_v32  ;;  %v716_v37 = vmax.f32 %v622_v33, 0.0  ;;  %v732_v38 = vmax.f32 %v686_v34, 0.0 }
 0x125   : > { %v626_v39 = vpop.f32.mrf.mxu0  ;;  %v690_v40 = vpop.f32.mrf.mxu1 }
 0x126   : > { %v1117_v41 = vpack.c.bf16 %v716_v37, %v716_v37  ;;  %v1133_v42 = vpack.c.bf16 %v732_v38, %v732_v38  ;;  %v627_v43 = vadd.f32 %v1395_v47, %v626_v39  ;;  %v691_v44 = vadd.f32 %v1395_v47, %v690_v40 }
 0x127   : > { %v628_v45 = vpop.f32.mrf.mxu0  ;;  %v692_v46 = vpop.f32.mrf.mxu1 }
 0x128   : > { %877 = vst.msk [vmem:[%s1403_s23 + $0x2c] sm:$0xf] %vm865_vm3, %v1117_v41  ;;  %893 = vst.msk [vmem:[%s1403_s23 + $0x6c] sm:$0xf] %vm865_vm3, %v1133_v42  ;;  %v717_v48 = vmax.f32 %v627_v43, 0.0  ;;  %v733_v49 = vmax.f32 %v691_v44, 0.0 }
 0x129   : > { %v629_v50 = vpop.f32.mrf.mxu0  ;;  %v693_v51 = vpop.f32.mrf.mxu1 }
 0x12a   : > { %v1118_v52 = vpack.c.bf16 %v717_v48, %v717_v48  ;;  %v1134_v53 = vpack.c.bf16 %v733_v49, %v733_v49  ;;  %v630_v54 = vadd.f32 %v1395_v47, %v629_v50  ;;  %v694_v55 = vadd.f32 %v1395_v47, %v693_v51 }
 0x12b   : > { %v631_v56 = vpop.f32.mrf.mxu0  ;;  %v695_v57 = vpop.f32.mrf.mxu1 }
 0x12c   : > { %878 = vst.msk [vmem:[%s1403_s23 + $0x30] sm:$0xf] %vm865_vm3, %v1118_v52  ;;  %894 = vst.msk [vmem:[%s1403_s23 + $0x70] sm:$0xf] %vm865_vm3, %v1134_v53  ;;  %v718_v58 = vmax.f32 %v630_v54, 0.0  ;;  %v734_v59 = vmax.f32 %v694_v55, 0.0 }
 0x12d   : > { %v634_v60 = vpop.f32.mrf.mxu0  ;;  %v698_v61 = vpop.f32.mrf.mxu1 }
 0x12e   : > { %v1119_v62 = vpack.c.bf16 %v718_v58, %v718_v58  ;;  %v1135_v63 = vpack.c.bf16 %v734_v59, %v734_v59  ;;  %v635_v0 = vadd.f32 %v1395_v47, %v634_v60  ;;  %v699_v1 = vadd.f32 %v1395_v47, %v698_v61 }
 0x12f   : > { %v636_v2 = vpop.f32.mrf.mxu0  ;;  %v700_v3 = vpop.f32.mrf.mxu1 }
 0x130   : > { %879 = vst.msk [vmem:[%s1403_s23 + $0x34] sm:$0xf] %vm865_vm3, %v1119_v62  ;;  %895 = vst.msk [vmem:[%s1403_s23 + $0x74] sm:$0xf] %vm865_vm3, %v1135_v63  ;;  %v719_v4 = vmax.f32 %v635_v0, 0.0  ;;  %v735_v5 = vmax.f32 %v699_v1, 0.0 }
 0x131   : > { %v637_v6 = vpop.f32.mrf.mxu0  ;;  %v701_v7 = vpop.f32.mrf.mxu1 }
 0x132   : > { %v1120_v8 = vpack.c.bf16 %v719_v4, %v719_v4  ;;  %v1136_v9 = vpack.c.bf16 %v735_v5, %v735_v5  ;;  %v638_v10 = vadd.f32 %v1395_v47, %v637_v6  ;;  %v702_v11 = vadd.f32 %v1395_v47, %v701_v7 }
 0x133   : > { %v639_v12 = vpop.f32.mrf.mxu0  ;;  %v703_v13 = vpop.f32.mrf.mxu1 }
 0x134   : > { %880 = vst.msk [vmem:[%s1403_s23 + $0x38] sm:$0xf] %vm865_vm3, %v1120_v8  ;;  %896 = vst.msk [vmem:[%s1403_s23 + $0x78] sm:$0xf] %vm865_vm3, %v1136_v9  ;;  %v720_v14 = vmax.f32 %v638_v10, 0.0  ;;  %v736_v15 = vmax.f32 %v702_v11, 0.0 }
 0x136   : > { %v1121_v16 = vpack.c.bf16 %v720_v14, %v720_v14  ;;  %v1137_v17 = vpack.c.bf16 %v736_v15, %v736_v15 }
 0x138   : > { %881 = vst.msk [vmem:[%s1403_s23 + $0x3c] sm:$0xf] %vm865_vm3, %v1121_v16  ;;  %897 = vst.msk [vmem:[%s1403_s23 + $0x7c] sm:$0xf] %vm865_vm3, %v1137_v17 }
 0x139 PF: > { %s13_s14 = sadd.s32 1, %s1264_s14   ;;  %s1512_s12 = smov %s1260_s13 }
 0x13a   : > { %p10_p5 = scmp.ge.s32.totalorder %s13_s14, 4   ;;  %s1513_s13 = smov %s1515_s15 }
 0x13c   :  { %12 = sbr.rel (!%p10_p5) target bundleno = 2 (0x2), region = 68 }

</bundles_post_ra>
